<compile_context>
chip_gen: v5e
topology: v5e:2x2
jax: 0.10.0
libtpu: 0.0.40
codegen_flags: <defaults>
</compile_context>

<pallas_src>
import jax
import jax.numpy as jnp
from jax.experimental import pallas as pl
from jax.experimental.pallas import tpu as pltpu


def _matmul_t_kernel(x1_ref, x2_ref, o_ref):
    a = x1_ref[...]  # a[k, i]
    b = x2_ref[...]  # b[k, j]
    # Promote to f32 for the VPU math (no-op when inputs are already f32;
    # avoids bf16 pack/unpack on v5e which lacks a bf16 VALU).
    if a.dtype != jnp.float32:
        a = a.astype(jnp.float32)
    if b.dtype != jnp.float32:
        b = b.astype(jnp.float32)
    # out[i, j] = sum_k a[k, i] * b[k, j]
    # K=2 contraction expressed as broadcasted multiply + reduce over the
    # leading axis: pure VPU work, no MXU tile, no explicit transpose.
    res = jnp.sum(a[:, :, None] * b[:, None, :], axis=0)
    if res.dtype != o_ref.dtype:
        res = res.astype(o_ref.dtype)
    o_ref[...] = res


def model_forward(x1: jax.Array, x2: jax.Array) -> jax.Array:
    """Pallas equivalent of Model.forward: x1^T @ x2 for (2,2) inputs."""
    m, _ = x1.shape
    _, n = x2.shape
    out_shape = jax.ShapeDtypeStruct((m, n), x1.dtype)
    # 2 matmuls of 2x2x2 -> 16 flops; 3 tiles of 16 bytes each -> 48 bytes.
    cost = pl.CostEstimate(flops=16, bytes_accessed=48, transcendentals=0)
    return pl.pallas_call(
        _matmul_t_kernel,
        out_shape=out_shape,
        # Tiny arrays: block == full array (full-extent blocks bypass the
        # (8,128) divisibility requirement); single grid point, no grid needed.
        in_specs=[
            pl.BlockSpec(x1.shape, lambda: (0, 0),
                         memory_space=pltpu.MemorySpace.VMEM),
            pl.BlockSpec(x2.shape, lambda: (0, 0),
                         memory_space=pltpu.MemorySpace.VMEM),
        ],
        out_specs=pl.BlockSpec((m, n), lambda: (0, 0),
                               memory_space=pltpu.MemorySpace.VMEM),
        cost_estimate=cost,
    )(x1, x2)


def model_forward_ref(x1: jax.Array, x2: jax.Array) -> jax.Array:
    v1 = x1.reshape((1, 2, 2))
    v2 = x2.reshape((1, 2, 2))
    v3 = jnp.matmul(jnp.transpose(v1, (0, 2, 1)), v2)
    return v3.reshape((2, 2))


if __name__ == "__main__":
    key = jax.random.PRNGKey(0)
    k1, k2 = jax.random.split(key)
    x1 = jax.random.normal(k1, (2, 2), dtype=jnp.float32)
    x2 = jax.random.normal(k2, (2, 2), dtype=jnp.float32)

    out = model_forward(x1, x2)
    out = jax.block_until_ready(out)

    ref = model_forward_ref(x1, x2)
    assert out.shape == (2, 2), out.shape
    assert jnp.allclose(out, ref, atol=1e-5, rtol=1e-5), (out, ref)
    print("KERNEL_OK")
</pallas_src>

<mosaic_0001>
module attributes {stable_mosaic.version = 11 : i64} {
  func.func @_matmul_t_kernel(%arg0: memref<2x2xf32, #tpu.memory_space<vmem>>, %arg1: memref<2x2xf32, #tpu.memory_space<vmem>>, %arg2: memref<2x2xf32, #tpu.memory_space<vmem>>) attributes {dimension_semantics = [], scalar_prefetch = 0 : i64, scratch_operands = 0 : i64, tpu.core_type = #tpu.core_type<tc>} {
    %c0 = arith.constant 0 : index
    %c0_0 = arith.constant 0 : index
    %0 = vector.load %arg0[%c0, %c0_0] : memref<2x2xf32, #tpu.memory_space<vmem>>, vector<2x2xf32>
    %c0_1 = arith.constant 0 : index
    %c0_2 = arith.constant 0 : index
    %1 = vector.load %arg1[%c0_1, %c0_2] : memref<2x2xf32, #tpu.memory_space<vmem>>, vector<2x2xf32>
    %2 = vector.shape_cast %0 : vector<2x2xf32> to vector<2x2x1xf32>
    %3 = vector.shape_cast %1 : vector<2x2xf32> to vector<2x1x2xf32>
    %4 = vector.broadcast %2 : vector<2x2x1xf32> to vector<2x2x2xf32>
    %5 = vector.broadcast %3 : vector<2x1x2xf32> to vector<2x2x2xf32>
    %6 = arith.mulf %4, %5 : vector<2x2x2xf32>
    %cst = arith.constant dense<0.000000e+00> : vector<2x2xf32>
    %7 = vector.multi_reduction <add>, %6, %cst [0] : vector<2x2x2xf32> to vector<2x2xf32>
    %c0_3 = arith.constant 0 : index
    %c0_4 = arith.constant 0 : index
    %8 = vector.load %arg2[%c0_3, %c0_4] : memref<2x2xf32, #tpu.memory_space<vmem>>, vector<2x2xf32>
    tpu.vector_store %arg2[%c0_3, %c0_4], %7 {strides = array<i32>} : memref<2x2xf32, #tpu.memory_space<vmem>>, vector<2x2xf32>,
    return
  }
}

</mosaic_0001>

<bundles_post_ra>
// kernel: tpu_custom_call.1
= control target key start
LH: loop header
LB: loop body
LE: loop exit
PB: predicated region body
PF: predicated region fallthrough
CT: control target
= control target key end

     0   :  { %7 = vsyncpa [#allocation3], 0  ;;  %s196_s0 = inlined_call_operand.hbm [shape: f32[2,2], index: 0, kind: input, shape index: {}]   ;;  %s197_s1 = inlined_call_operand.hbm [shape: f32[2,2], index: 1, kind: input, shape index: {}]   ;;  %s198_s2 = inlined_call_operand.hbm [shape: f32[2,2], index: 2, kind: output, shape index: {}]  }
   0x1   :  { %8 = vsyncpa [#allocation6], 0 }
   0x2   :  { %9 = vsyncpa [#allocation4], 0  ;;  %s15_s11 = sshll.u32 %s196_s0, 4  ;;  %s169_s12 = smov [#allocation2]   ;;  %s16_s11 = int_to_ptr.hbm [resolvable:$true] %s15_s11 }
   0x3   :  { %s17_s13 = sshll.u32 %s169_s12, 4  ;;  %s26_s16 = sshll.u32 %s197_s1, 4  ;;  %s18_s13 = int_to_ptr.vmem [resolvable:$true] %s17_s13  ;;  %s27_s16 = int_to_ptr.hbm [resolvable:$true] %s26_s16 }
   0x4   :  { %20 = dma.hbm_to_vmem [thread:$0]  %s16_s11, 32, %s18_s13, [#allocation3]  }
   0x5   :  { %s170_s17 = smov [#allocation5]  }
   0x6   :  { %s28_s18 = sshll.u32 %s170_s17, 4  ;;  %s29_s18 = int_to_ptr.vmem [resolvable:$true] %s28_s18 }
   0x7   :  { %31 = dma.hbm_to_vmem [thread:$0]  %s27_s16, 32, %s29_s18, [#allocation6]  }
   0x8   :  { %163 = dma.done.wait [#allocation3], 32  }
   0x9   :  { %164 = vsyncadd [#allocation3], 4294967264 }
   0xa   :  { %165 = dma.done.wait [#allocation6], 32  }
   0xb   :  { %166 = vsyncadd [#allocation6], 4294967264  ;;  %v43_v0 = vlaneseq  ;;  %v40_v2 = vld [vmem:[#allocation2] sm:$0x3]  ;;  %v41_v5 = vld [vmem:[#allocation5] sm:$0x3] }
   0xc   :  { %v42_v3 = vperm.slane %v40_v2, 0  ;;  %v49_v4 = vperm.slane %v40_v2, 1  ;;  %v57_v7 = vrot.slane %v41_v5, 1  ;;  %v58_v8 = vperm.slane %v41_v5, 0  ;;  %s171_s0 = smov [#allocation7]   ;;  %s76_s21 = sshll.u32 %s198_s2, 4  ;;  %s77_s21 = int_to_ptr.hbm [resolvable:$true] %s76_s21 }
   0xd   :  { %v44_v1 = vshrl.u32 %v43_v0, 7  ;;  %vm64_vm0 = vcmask 9216   ;;  %s74_s1 = sshll.u32 %s171_s0, 4  ;;  %s75_s1 = int_to_ptr.vmem [resolvable:$true] %s74_s1 }
   0xe   :  { %v59_v9 = vperm.slane %v57_v7, 0 }
   0xf   :  { %90 = vset.pattern.permute.xlu0 %v44_v1 }
  0x17   :  { %47 = vperm.xlu0 %90, %v42_v3  }
  0x1f   :  { %54 = vperm.xlu0 %90, %v49_v4  }
  0x89   :  { %v48_v6 = vpop.permute.xlu0 %47 }
  0x8a   :  { %v62_v10 = vmul.f32 %v58_v8, %v48_v6 }
  0x8c   :  { %v65_v13 = vsel %vm64_vm0, %v62_v10, 0.0 }
  0x91   :  { %v55_v11 = vpop.permute.xlu0 %54 }
  0x92   :  { %v63_v12 = vmul.f32 %v59_v9, %v55_v11 }
  0x94   :  { %v66_v14 = vsel %vm64_vm0, %v63_v12, 0.0 }
  0x95   :  { %v67_v15 = vadd.f32 %v66_v14, %v65_v13 }
  0x97   :  { %68 = vst.msk [vmem:[#allocation7] sm:$0x3] %vm64_vm0, %v67_v15 }
  0x98   :  { %79 = dma.vmem_to_hbm [thread:$0]  %s75_s1, 32, %s77_s21, [#allocation4]  }
  0x99   :  { %167 = dma.done.wait [#allocation4], 32  }
  0x9a   :  { %168 = vsyncadd [#allocation4], 4294967264 }
  0x9b   :  { %84 = vsyncpa [#allocation3], 1 }
  0x9c   :  { %85 = vsyncpa [#allocation6], 1 }
  0x9d   :  { %86 = vsyncpa [#allocation4], 1 }

</bundles_post_ra>
